<compile_context>
chip_gen: v5e
topology: v5e:2x2
jax: 0.10.0
libtpu: 0.0.40
codegen_flags: <defaults>
</compile_context>

<pallas_src>
import functools

import numpy as np

import jax
import jax.numpy as jnp
from jax.experimental import pallas as pl
from jax.experimental.pallas import tpu as pltpu


# ----------------------------- hyperparameters -----------------------------
VOCAB_SIZE = 50
EMBED_SIZE = 32          # E
MAX_SEQ_LEN = 16         # L
KERNEL_NUM = 8           # C (out channels per conv branch)
KERNEL_SIZES = (3, 4, 5)
DROPOUT = 0.5            # eval-mode: identity
LABEL_SIZE = 4
BATCH = 2

LANE = 128               # lane width / MXU tile


def _round_up(x, m):
    return -(-x // m) * m


# --------------------------------- kernel ----------------------------------
def _textcnn_kernel(onehot_ref, table_ref, wf_ref, bias_ref, mask_ref,
                    fcw_ref, fcb_ref, out_ref, *, B, L_pad, t_slice, max_k):
    """Fused TextCNN forward.

    onehot_ref : (B*L_pad, V_pad) bf16   host-built one-hot token rows
    table_ref  : (V_pad, E_pad)   bf16   embedding table (zero-padded)
    wf_ref     : (E_pad, max_k*128) bf16 fused conv weights, 128-lane dk blocks
    bias_ref   : (1, 128) f32            fused conv biases (branch-major, zero pad)
    mask_ref   : (t_slice, 128) f32      constant 0/1 pool mask
    fcw_ref    : (128, 128) f32          Linear weight (transposed, zero padded)
    fcb_ref    : (1, 128) f32
    out_ref    : (B, 128) f32            lane-dense logit slab
    """
    # (1) Embedding gather as one bf16 MXU matmul: one_hot(ids) @ table.
    #     Result is exact bf16 table values accumulated in f32.
    emb = jnp.dot(onehot_ref[...], table_ref[...],
                  preferred_element_type=jnp.float32)            # (R, E_pad) f32

    # (2) All conv branches and tap offsets in ONE matmul.  Per-dk column blocks
    #     occupy full 128-lane groups (zeros where dk >= k or lane >= n*C).
    p = jnp.dot(emb.astype(jnp.bfloat16), wf_ref[...],
                preferred_element_type=jnp.float32)              # (R, max_k*128)
    p3 = p.reshape(B, L_pad, max_k * LANE)

    # (3) Combine time-shifted partial products on the SMALL post-matmul tensor;
    #     each dk block is a whole lane group -> pure VPU adds + sublane shifts.
    #     Shift is along axis=1, so batch boundaries are respected.
    acc = p3[:, 0:t_slice, 0:LANE]
    for dk in range(1, max_k):
        acc = acc + p3[:, dk:dk + t_slice, dk * LANE:(dk + 1) * LANE]

    # (4) One bias add + ReLU in f32 (v5e VPU/EUP have no bf16). Padding lanes
    #     have zero weights + zero bias, so they stay 0.
    acc = jnp.maximum(acc + bias_ref[...][None, :, :], 0.0)      # (B, t_slice, 128)

    # (5) Masked max-pool over time with a precomputed constant mask. Masking
    #     with 0 is exact because ReLU output >= 0.  Channel layout is already
    #     branch-contiguous, so the concat is free.
    pooled = jnp.max(acc * mask_ref[...][None, :, :], axis=1)    # (B, 128)

    # TODO(synk): nn.Dropout is identity in eval mode; training dropout not implemented.

    # (6) Lane-dense fc: padded (128, 128) weight; wrapper slices the valid cols.
    logits = (jnp.dot(pooled, fcw_ref[...], preferred_element_type=jnp.float32)
              + fcb_ref[...])
    out_ref[...] = logits.astype(out_ref.dtype)


# -------------------------------- wrapper -----------------------------------
def _build_fused_params(embedding_table, conv_ws, conv_bs, fc_w, fc_b,
                        kernel_sizes, label_size):
    """Host-side weight packing: lane-dense, contraction padded to 128, bf16 MXU operands."""
    V, E = embedding_table.shape
    C = conv_ws[0].shape[-1]
    n = len(kernel_sizes)
    nc = n * C
    max_k = max(kernel_sizes)
    v_pad = _round_up(max(V, LANE), LANE)
    e_pad = _round_up(max(E, LANE), LANE)

    table_p = (jnp.zeros((v_pad, e_pad), jnp.float32)
               .at[:V, :E].set(embedding_table)).astype(jnp.bfloat16)

    # Fused conv weight: column layout [dk=0 | dk=1 | ... | dk=max_k-1], each a
    # 128-lane block holding channels [branch0 | branch1 | branch2] (zero pad).
    wf = jnp.zeros((e_pad, max_k * LANE), jnp.float32)
    for dk in range(max_k):
        for bi, k in enumerate(kernel_sizes):
            if dk < k:
                col = dk * LANE + bi * C
                wf = wf.at[:E, col:col + C].set(conv_ws[bi][dk])
    wf = wf.astype(jnp.bfloat16)

    bias = jnp.zeros((1, LANE), jnp.float32)
    for bi in range(n):
        bias = bias.at[0, bi * C:(bi + 1) * C].set(conv_bs[bi][0])

    fcw_p = jnp.zeros((LANE, LANE), jnp.float32).at[:nc, :label_size].set(fc_w)
    fcb_p = jnp.zeros((1, LANE), jnp.float32).at[0, :label_size].set(fc_b[0])
    return table_p, wf, bias, fcw_p, fcb_p, v_pad


def textcnn_forward(tokens, embedding_table, conv_ws, conv_bs, fc_w, fc_b,
                    *, kernel_sizes=KERNEL_SIZES, label_size=LABEL_SIZE):
    """tokens: (B, L) int32 ids; returns logits (B, label_size)."""
    B, L = tokens.shape
    C = conv_ws[0].shape[-1]
    max_k = max(kernel_sizes)
    t_slice = L                                   # >= L - min_k + 1, sublane aligned
    l_pad = _round_up(max_k - 1 + t_slice, 8)     # shifted slices stay in bounds

    table_p, wf, bias, fcw_p, fcb_p, v_pad = _build_fused_params(
        embedding_table, conv_ws, conv_bs, fc_w, fc_b, kernel_sizes, label_size)

    # Host-side one-hot (bf16, lane-dense).  Padded positions use token 0; they
    # only ever feed masked pool slots, so the value is irrelevant.
    ids_p = jnp.zeros((B, l_pad), jnp.int32).at[:, :L].set(tokens).reshape(-1)
    one_hot = jax.nn.one_hot(ids_p, v_pad, dtype=jnp.bfloat16)   # (B*l_pad, v_pad)

    # Trace-time constant 0/1 pool mask: position t is valid for branch bi iff
    # t <= L - k_bi; lanes >= n*C are padding.
    mask_np = np.zeros((t_slice, LANE), np.float32)
    for bi, k in enumerate(kernel_sizes):
        mask_np[:L - k + 1, bi * C:(bi + 1) * C] = 1.0
    mask = jnp.asarray(mask_np)

    kernel = functools.partial(
        _textcnn_kernel, B=B, L_pad=l_pad, t_slice=t_slice, max_k=max_k)

    vmem = pl.BlockSpec(memory_space=pltpu.MemorySpace.VMEM)
    out = pl.pallas_call(
        kernel,
        out_shape=jax.ShapeDtypeStruct((B, LANE), jnp.float32),
        in_specs=[vmem] * 7,
        out_specs=vmem,
    )(one_hot, table_p, wf, bias, mask, fcw_p, fcb_p)
    return out[:, :label_size]


# ------------------------------- reference ----------------------------------
def _reference_forward(tokens, embedding_table, conv_ws, conv_bs, fc_w, fc_b,
                       kernel_sizes):
    """Pure-JAX f32 reference mirroring the PyTorch forward (eval mode)."""
    emb = jnp.take(embedding_table, tokens, axis=0)   # (B, L, E)
    B, L, E = emb.shape
    pooled = []
    for w, b, k in zip(conv_ws, conv_bs, kernel_sizes):
        T = L - k + 1
        acc = jnp.zeros((B, T, w.shape[-1]), jnp.float32)
        for dk in range(k):
            acc = acc + jnp.einsum("bte,ec->btc", emb[:, dk:dk + T, :], w[dk])
        acc = jax.nn.relu(acc + b[None, :, :])
        pooled.append(jnp.max(acc, axis=1))
    feat = jnp.concatenate(pooled, axis=-1)
    return feat @ fc_w + fc_b


if __name__ == "__main__":
    key = jax.random.PRNGKey(0)
    keys = jax.random.split(key, 4 + 2 * len(KERNEL_SIZES))

    # Deterministic synthetic parameters (shapes follow TextCNN.__init__).
    embedding_table = jax.random.normal(
        keys[0], (VOCAB_SIZE, EMBED_SIZE), jnp.float32) * 0.1

    conv_ws, conv_bs = [], []
    for i, k in enumerate(KERNEL_SIZES):
        # torch Conv2d weight (C, 1, k, E) -> stored as (k, E, C)
        w = jax.random.normal(
            keys[1 + 2 * i], (k, EMBED_SIZE, KERNEL_NUM), jnp.float32) * 0.1
        b = jax.random.normal(
            keys[2 + 2 * i], (1, KERNEL_NUM), jnp.float32) * 0.1
        conv_ws.append(w)
        conv_bs.append(b)

    # torch Linear weight (label_size, n*C) -> stored transposed (n*C, label_size)
    fc_w = jax.random.normal(
        keys[-2], (len(KERNEL_SIZES) * KERNEL_NUM, LABEL_SIZE), jnp.float32) * 0.1
    fc_b = jax.random.normal(keys[-1], (1, LABEL_SIZE), jnp.float32) * 0.1

    # Inputs: token ids (B, L).
    token_key = jax.random.fold_in(key, 123)
    tokens = jax.random.randint(
        token_key, (BATCH, MAX_SEQ_LEN), 0, VOCAB_SIZE, jnp.int32)

    logits = textcnn_forward(tokens, embedding_table, conv_ws, conv_bs, fc_w, fc_b)
    logits = jax.block_until_ready(logits)

    ref = _reference_forward(tokens, embedding_table, conv_ws, conv_bs,
                             fc_w, fc_b, KERNEL_SIZES)
    assert logits.shape == (BATCH, LABEL_SIZE)
    # bf16 MXU operands vs. f32 reference -> loosened tolerance.
    assert jnp.allclose(logits, ref, atol=1e-2, rtol=1e-2), (logits, ref)

    print("KERNEL_OK")
</pallas_src>

<mosaic_0001>
module attributes {stable_mosaic.version = 11 : i64} {
  func.func @_textcnn_kernel(%arg0: memref<48x128xbf16, #tpu.memory_space<vmem>>, %arg1: memref<128x128xbf16, #tpu.memory_space<vmem>>, %arg2: memref<128x640xbf16, #tpu.memory_space<vmem>>, %arg3: memref<1x128xf32, #tpu.memory_space<vmem>>, %arg4: memref<16x128xf32, #tpu.memory_space<vmem>>, %arg5: memref<128x128xf32, #tpu.memory_space<vmem>>, %arg6: memref<1x128xf32, #tpu.memory_space<vmem>>, %arg7: memref<2x128xf32, #tpu.memory_space<vmem>>) attributes {dimension_semantics = [], scalar_prefetch = 0 : i64, scratch_operands = 0 : i64, tpu.core_type = #tpu.core_type<tc>} {
    %c0 = arith.constant 0 : index
    %c0_0 = arith.constant 0 : index
    %0 = vector.load %arg0[%c0, %c0_0] : memref<48x128xbf16, #tpu.memory_space<vmem>>, vector<48x128xbf16>
    %c0_1 = arith.constant 0 : index
    %c0_2 = arith.constant 0 : index
    %1 = vector.load %arg1[%c0_1, %c0_2] : memref<128x128xbf16, #tpu.memory_space<vmem>>, vector<128x128xbf16>
    %cst = arith.constant dense<0.000000e+00> : vector<48x128xf32>
    %2 = tpu.matmul %0, %1, %cst {dimension_numbers = #tpu.dot_dimension_numbers<[1], [0], [0], [1], [0, 0, 1, 1], [], []>} : vector<48x128xbf16>, vector<128x128xbf16>, vector<48x128xf32> -> vector<48x128xf32>
    %3 = arith.truncf %2 : vector<48x128xf32> to vector<48x128xbf16>
    %c0_3 = arith.constant 0 : index
    %c0_4 = arith.constant 0 : index
    %4 = vector.load %arg2[%c0_3, %c0_4] : memref<128x640xbf16, #tpu.memory_space<vmem>>, vector<128x640xbf16>
    %cst_5 = arith.constant dense<0.000000e+00> : vector<48x640xf32>
    %5 = tpu.matmul %3, %4, %cst_5 {dimension_numbers = #tpu.dot_dimension_numbers<[1], [0], [0], [1], [0, 0, 1, 1], [], []>} : vector<48x128xbf16>, vector<128x640xbf16>, vector<48x640xf32> -> vector<48x640xf32>
    %6 = vector.shape_cast %5 : vector<48x640xf32> to vector<2x24x640xf32>
    %7 = vector.extract_strided_slice %6 {offsets = [0, 0, 0], sizes = [2, 16, 128], strides = [1, 1, 1]} : vector<2x24x640xf32> to vector<2x16x128xf32>
    %8 = vector.extract_strided_slice %6 {offsets = [0, 1, 128], sizes = [2, 16, 128], strides = [1, 1, 1]} : vector<2x24x640xf32> to vector<2x16x128xf32>
    %9 = arith.addf %7, %8 : vector<2x16x128xf32>
    %10 = vector.extract_strided_slice %6 {offsets = [0, 2, 256], sizes = [2, 16, 128], strides = [1, 1, 1]} : vector<2x24x640xf32> to vector<2x16x128xf32>
    %11 = arith.addf %9, %10 : vector<2x16x128xf32>
    %12 = vector.extract_strided_slice %6 {offsets = [0, 3, 384], sizes = [2, 16, 128], strides = [1, 1, 1]} : vector<2x24x640xf32> to vector<2x16x128xf32>
    %13 = arith.addf %11, %12 : vector<2x16x128xf32>
    %14 = vector.extract_strided_slice %6 {offsets = [0, 4, 512], sizes = [2, 16, 128], strides = [1, 1, 1]} : vector<2x24x640xf32> to vector<2x16x128xf32>
    %15 = arith.addf %13, %14 : vector<2x16x128xf32>
    %c0_6 = arith.constant 0 : index
    %c0_7 = arith.constant 0 : index
    %16 = vector.load %arg3[%c0_6, %c0_7] : memref<1x128xf32, #tpu.memory_space<vmem>>, vector<1x128xf32>
    %17 = vector.shape_cast %16 : vector<1x128xf32> to vector<1x1x128xf32>
    %18 = vector.broadcast %17 : vector<1x1x128xf32> to vector<2x16x128xf32>
    %19 = arith.addf %15, %18 : vector<2x16x128xf32>
    %cst_8 = arith.constant 0.000000e+00 : f32
    %20 = vector.broadcast %cst_8 : f32 to vector<2x16x128xf32>
    %21 = arith.maximumf %19, %20 : vector<2x16x128xf32>
    %c0_9 = arith.constant 0 : index
    %c0_10 = arith.constant 0 : index
    %22 = vector.load %arg4[%c0_9, %c0_10] : memref<16x128xf32, #tpu.memory_space<vmem>>, vector<16x128xf32>
    %23 = vector.shape_cast %22 : vector<16x128xf32> to vector<1x16x128xf32>
    %24 = vector.broadcast %23 : vector<1x16x128xf32> to vector<2x16x128xf32>
    %25 = arith.mulf %21, %24 : vector<2x16x128xf32>
    %cst_11 = arith.constant dense<0xFF800000> : vector<2x128xf32>
    %26 = vector.multi_reduction <maximumf>, %25, %cst_11 [1] : vector<2x16x128xf32> to vector<2x128xf32>
    %c0_12 = arith.constant 0 : index
    %c0_13 = arith.constant 0 : index
    %27 = vector.load %arg5[%c0_12, %c0_13] : memref<128x128xf32, #tpu.memory_space<vmem>>, vector<128x128xf32>
    %cst_14 = arith.constant dense<0.000000e+00> : vector<2x128xf32>
    %28 = tpu.matmul %26, %27, %cst_14 {dimension_numbers = #tpu.dot_dimension_numbers<[1], [0], [0], [1], [0, 0, 1, 1], [], []>} : vector<2x128xf32>, vector<128x128xf32>, vector<2x128xf32> -> vector<2x128xf32>
    %c0_15 = arith.constant 0 : index
    %c0_16 = arith.constant 0 : index
    %29 = vector.load %arg6[%c0_15, %c0_16] : memref<1x128xf32, #tpu.memory_space<vmem>>, vector<1x128xf32>
    %30 = vector.broadcast %29 : vector<1x128xf32> to vector<2x128xf32>
    %31 = arith.addf %28, %30 : vector<2x128xf32>
    %c0_17 = arith.constant 0 : index
    %c0_18 = arith.constant 0 : index
    %32 = vector.load %arg7[%c0_17, %c0_18] : memref<2x128xf32, #tpu.memory_space<vmem>>, vector<2x128xf32>
    tpu.vector_store %arg7[%c0_17, %c0_18], %31 {strides = array<i32>} : memref<2x128xf32, #tpu.memory_space<vmem>>, vector<2x128xf32>,
    return
  }
}

</mosaic_0001>

<bundles_post_ra>
// kernel: tpu_custom_call.1
= control target key start
LH: loop header
LB: loop body
LE: loop exit
PB: predicated region body
PF: predicated region fallthrough
CT: control target
= control target key end

     0   :  { %12 = vsyncpa [#allocation3], 0  ;;  %s1335_s0 = inlined_call_operand.hbm [shape: bf16[48,128], index: 0, kind: input, shape index: {}]   ;;  %s1336_s1 = inlined_call_operand.hbm [shape: bf16[128,128], index: 1, kind: input, shape index: {}]   ;;  %s1337_s2 = inlined_call_operand.hbm [shape: bf16[128,640], index: 2, kind: input, shape index: {}]   ;;  %s1338_s3 = inlined_call_operand.vmem [shape: f32[1,128], index: 3, kind: input, shape index: {}]   ;;  %s1339_s4 = inlined_call_operand.hbm [shape: f32[16,128], index: 4, kind: input, shape index: {}]   ;;  %s1340_s5 = inlined_call_operand.hbm [shape: f32[128,128], index: 5, kind: input, shape index: {}]   ;;  %s1341_s6 = inlined_call_operand.vmem [shape: f32[1,128], index: 6, kind: input, shape index: {}]   ;;  %s1342_s7 = inlined_call_operand.hbm [shape: f32[2,128], index: 7, kind: output, shape index: {}]  }
   0x1   :  { %13 = vsyncpa [#allocation6], 0 }
   0x2   :  { %14 = vsyncpa [#allocation9], 0 }
   0x3   :  { %15 = vsyncpa [#allocation4], 0  ;;  %s33_s26 = sshll.u32 %s1336_s1, 4  ;;  %s1228_s27 = smov [#allocation5]   ;;  %s34_s26 = int_to_ptr.hbm [resolvable:$true] %s33_s26 }
   0x4   :  { %s35_s28 = sshll.u32 %s1228_s27, 4  ;;  %s61_s8 = sshll.u32 %s1339_s4, 4  ;;  %s36_s28 = int_to_ptr.vmem [resolvable:$true] %s35_s28  ;;  %s62_s8 = int_to_ptr.hbm [resolvable:$true] %s61_s8 }
   0x5   :  { %s1229_s9 = smov 64   ;;  %s1230_s10 = smov 4  }
   0x6   :  { %41 = dma.hbm_to_vmem [thread:$0]  %s34_s26, 1024, %s36_s28, [#allocation6], %s1229_s9, %s1229_s9, %s1230_s10  }
   0x7   :  { %s1231_s11 = smov [#allocation8]   ;;  %s1232_s13 = smov 128  }
   0x8   :  { %s63_s12 = sshll.u32 %s1231_s11, 4  ;;  %s1233_s14 = smov 8   ;;  %s64_s12 = int_to_ptr.vmem [resolvable:$true] %s63_s12 }
   0x9   :  { %69 = dma.hbm_to_vmem [thread:$0]  %s62_s8, 256, %s64_s12, [#allocation9], %s1232_s13, %s1232_s13, %s1233_s14  }
   0xa   :  { %s20_s16 = sshll.u32 %s1335_s0, 4  ;;  %s1234_s17 = smov [#allocation2]   ;;  %s21_s16 = int_to_ptr.hbm [resolvable:$true] %s20_s16 }
   0xb   :  { %s22_s18 = sshll.u32 %s1234_s17, 4  ;;  %s46_s20 = sshll.u32 %s1337_s2, 4  ;;  %s23_s18 = int_to_ptr.vmem [resolvable:$true] %s22_s18  ;;  %s47_s20 = int_to_ptr.hbm [resolvable:$true] %s46_s20 }
   0xc   :  { %28 = dma.hbm_to_vmem [thread:$0]  %s21_s16, 384, %s23_s18, [#allocation3], %s1229_s9, %s1229_s9, %s1230_s10  }
   0xd   :  { %s1235_s21 = smov [#allocation7]   ;;  %s1236_s23 = smov 320  }
   0xe   :  { %s48_s22 = sshll.u32 %s1235_s21, 4  ;;  %s1237_s24 = smov 20   ;;  %s49_s22 = int_to_ptr.vmem [resolvable:$true] %s48_s22 }
   0xf   :  { %54 = dma.hbm_to_vmem [thread:$0]  %s47_s20, 5120, %s49_s22, [#allocation6], %s1236_s23, %s1236_s23, %s1237_s24  }
  0x10   :  { %s74_s0 = sshll.u32 %s1340_s5, 4  ;;  %s1238_s27 = smov [#allocation10]   ;;  %s75_s0 = int_to_ptr.hbm [resolvable:$true] %s74_s0 }
  0x11   :  { %s76_s28 = sshll.u32 %s1238_s27, 4  ;;  %s77_s28 = int_to_ptr.vmem [resolvable:$true] %s76_s28 }
  0x12   :  { %82 = dma.hbm_to_vmem [thread:$0]  %s75_s0, 2048, %s77_s28, [#allocation9], %s1232_s13, %s1232_s13, %s1233_s14  }
  0x13   :  { %1220 = dma.done.wait [#allocation3], 384  }
  0x14   :  { %1221 = vsyncadd [#allocation3], 4294966912 }
  0x15   :  { %1222 = dma.done.wait [#allocation6], 6144  }
  0x16   :  { %1223 = vsyncadd [#allocation6], 4294961152 }
  0x17   :  { %1224 = dma.done.wait [#allocation9], 2304  }
  0x18   :  { %1225 = vsyncadd [#allocation9], 4294964992  ;;  %v1005_v0 = vld [vmem:[#allocation5 + $0x38] sm:$0xff]  ;;  %v1004_v1 = vld [vmem:[#allocation5 + $0x30] sm:$0xff]  ;;  %vm600_vm0 = vcmask 1046528   ;;  %vm625_vm1 = vcmask 1045504  }
  0x19   :  { %193 = vmatpush.bf16.msra.mxu0 %v1005_v0  ;;  %1046 = vmatpush.bf16.msra.mxu3 %v1005_v0  ;;  %v1003_v2 = vld [vmem:[#allocation5 + $0x28] sm:$0xff]  ;;  %v1002_v3 = vld [vmem:[#allocation5 + $0x20] sm:$0xff]  ;;  %v1001_v4 = vld [vmem:[#allocation5 + $0x18] sm:$0xff]  ;;  %vm650_vm2 = vcmask 1044480   ;;  %vm675_vm3 = vcmask 1043456   ;;  %vm748_vm4 = vcmask 1041409  }
  0x1a   :  { %v977_v5 = vld [vmem:[#allocation7 + $0x118] sm:$0xf]  ;;  %v1043_v6 = vld [vmem:[#allocation7 + $0x128] sm:$0xf0]  ;;  %v957_v7 = vld [vmem:[#allocation7 + $0xf0] sm:$0xf] }
  0x1b   :  { %v1000_v8 = vld [vmem:[#allocation5 + $0x10] sm:$0xff]  ;;  %v978_v9 = vor.u32 %v1043_v6, %v977_v5  ;;  %v1038_v10 = vld [vmem:[#allocation7 + $0x100] sm:$0xf0]  ;;  %v937_v12 = vld [vmem:[#allocation7 + $0xc8] sm:$0xf]  ;;  %s1239_s30 = smov [#allocation11]  }
  0x1c   :  { %v958_v11 = vor.u32 %v1038_v10, %v957_v7  ;;  %v1033_v13 = vld [vmem:[#allocation7 + $0xd8] sm:$0xf0]  ;;  %v999_v14 = vld [vmem:[#allocation5 + $0x8] sm:$0xff]  ;;  %v985_v15 = vld [vmem:[#allocation7 + $0x120] sm:$0xf]  ;;  %s777_s8 = sshll.u32 %s1239_s30, 4  ;;  %s778_s8 = int_to_ptr.vmem [resolvable:$true] %s777_s8 }
  0x1d   :  { %194 = vmatpush.bf16.msra.mxu0 %v1004_v1  ;;  %1047 = vmatpush.bf16.msra.mxu3 %v1004_v1  ;;  %v1044_v16 = vld [vmem:[#allocation7 + $0x130] sm:$0xf0]  ;;  %v1042_v17 = vld [vmem:[#allocation7 + $0x124] sm:$0xf]  ;;  %v987_v18 = vld [vmem:[#allocation7 + $0x134] sm:$0xf0]  ;;  %v938_v19 = vor.u32 %v1033_v13, %v937_v12 }
  0x1e   :  { %1054 = vmatpush.bf16.msra.mxu2 %v978_v9  ;;  %476 = vmatpush.bf16.msra.mxu1 %v978_v9  ;;  %v917_v20 = vld [vmem:[#allocation7 + $0xa0] sm:$0xf]  ;;  %v1028_v21 = vld [vmem:[#allocation7 + $0xb0] sm:$0xf0]  ;;  %v995_v23 = vld [vmem:[#allocation2] sm:$0xff]  ;;  %v986_v24 = vor.u32 %v1044_v16, %v985_v15  ;;  %v990_v25 = vor.u32 %v1042_v17, %v987_v18  ;;  %s779_s11 = sshll.u32 %s1342_s7, 4  ;;  %s780_s11 = int_to_ptr.hbm [resolvable:$true] %s779_s11 }
  0x1f   :  { %v998_v22 = vld [vmem:[#allocation5] sm:$0xff]  ;;  %v965_v26 = vld [vmem:[#allocation7 + $0xf8] sm:$0xf]  ;;  %v1039_v27 = vld [vmem:[#allocation7 + $0x108] sm:$0xf0]  ;;  %v918_v30 = vor.u32 %v1028_v21, %v917_v20 }
  0x20   :  { %v1037_v28 = vld [vmem:[#allocation7 + $0xfc] sm:$0xf]  ;;  %v967_v29 = vld [vmem:[#allocation7 + $0x10c] sm:$0xf0]  ;;  %v897_v32 = vld [vmem:[#allocation7 + $0x78] sm:$0xf]  ;;  %v966_v34 = vor.u32 %v1039_v27, %v965_v26 }
  0x21   :  { %195 = vmatpush.bf16.msra.mxu0 %v1003_v2  ;;  %1048 = vmatpush.bf16.msra.mxu3 %v1003_v2  ;;  %v997_v31 = vld [vmem:[#allocation2 + $0x10] sm:$0xff]  ;;  %v1023_v33 = vld [vmem:[#allocation7 + $0x88] sm:$0xf0]  ;;  %v970_v35 = vor.u32 %v1037_v28, %v967_v29  ;;  %v945_v36 = vld [vmem:[#allocation7 + $0xd0] sm:$0xf] }
  0x22   :  { %1055 = vmatpush.bf16.msra.mxu2 %v958_v11  ;;  %477 = vmatpush.bf16.msra.mxu1 %v958_v11  ;;  %v1034_v37 = vld [vmem:[#allocation7 + $0xe0] sm:$0xf0]  ;;  %v1032_v38 = vld [vmem:[#allocation7 + $0xd4] sm:$0xf]  ;;  %v947_v39 = vld [vmem:[#allocation7 + $0xe4] sm:$0xf0]  ;;  %v898_v40 = vor.u32 %v1023_v33, %v897_v32 }
  0x23   :  { %v877_v41 = vld [vmem:[#allocation7 + $0x50] sm:$0xf]  ;;  %v1018_v42 = vld [vmem:[#allocation7 + $0x60] sm:$0xf0]  ;;  %v946_v43 = vor.u32 %v1034_v37, %v945_v36  ;;  %v950_v44 = vor.u32 %v1032_v38, %v947_v39  ;;  %v925_v45 = vld [vmem:[#allocation7 + $0xa8] sm:$0xf] }
  0x24   :  { %v1029_v46 = vld [vmem:[#allocation7 + $0xb8] sm:$0xf0]  ;;  %v1027_v47 = vld [vmem:[#allocation7 + $0xac] sm:$0xf]  ;;  %v927_v48 = vld [vmem:[#allocation7 + $0xbc] sm:$0xf0]  ;;  %v878_v49 = vor.u32 %v1018_v42, %v877_v41 }
  0x25   :  { %196 = vmatpush.bf16.msra.mxu0 %v1002_v3  ;;  %1049 = vmatpush.bf16.msra.mxu3 %v1002_v3  ;;  %v857_v50 = vld [vmem:[#allocation7 + $0x28] sm:$0xf]  ;;  %v1013_v51 = vld [vmem:[#allocation7 + $0x38] sm:$0xf0]  ;;  %v926_v52 = vor.u32 %v1029_v46, %v925_v45  ;;  %v930_v53 = vor.u32 %v1027_v47, %v927_v48  ;;  %v905_v54 = vld [vmem:[#allocation7 + $0x80] sm:$0xf] }
  0x26   :  { %1056 = vmatpush.bf16.msra.mxu2 %v938_v19  ;;  %478 = vmatpush.bf16.msra.mxu1 %v938_v19  ;;  %v1024_v55 = vld [vmem:[#allocation7 + $0x90] sm:$0xf0]  ;;  %v1022_v56 = vld [vmem:[#allocation7 + $0x84] sm:$0xf]  ;;  %v907_v57 = vld [vmem:[#allocation7 + $0x94] sm:$0xf0]  ;;  %v858_v58 = vor.u32 %v1013_v51, %v857_v50 }
  0x27   :  { %v906_v59 = vor.u32 %v1024_v55, %v905_v54  ;;  %v910_v60 = vor.u32 %v1022_v56, %v907_v57  ;;  %v996_v61 = vld [vmem:[#allocation2 + $0x8] sm:$0xff]  ;;  %v885_v62 = vld [vmem:[#allocation7 + $0x58] sm:$0xf]  ;;  %v1019_v63 = vld [vmem:[#allocation7 + $0x68] sm:$0xf0] }
  0x28   :  { %v1017_v0 = vld [vmem:[#allocation7 + $0x5c] sm:$0xf]  ;;  %v886_v1 = vor.u32 %v1019_v63, %v885_v62  ;;  %v887_v2 = vld [vmem:[#allocation7 + $0x6c] sm:$0xf0]  ;;  %v837_v3 = vld [vmem:[#allocation7] sm:$0xf] }
  0x29   :  { %197 = vmatpush.bf16.msra.mxu0 %v1001_v4  ;;  %1050 = vmatpush.bf16.msra.mxu3 %v1001_v4  ;;  %v1008_v4 = vld [vmem:[#allocation7 + $0x10] sm:$0xf0]  ;;  %v890_v5 = vor.u32 %v1017_v0, %v887_v2  ;;  %v1041_v7 = vld [vmem:[#allocation7 + $0x11c] sm:$0xf]  ;;  %v865_v10 = vld [vmem:[#allocation7 + $0x30] sm:$0xf] }
  0x2a   :  { %1057 = vmatpush.bf16.msra.mxu2 %v918_v30  ;;  %479 = vmatpush.bf16.msra.mxu1 %v918_v30  ;;  %v838_v6 = vor.u32 %v1008_v4, %v837_v3  ;;  %v1014_v11 = vld [vmem:[#allocation7 + $0x40] sm:$0xf0]  ;;  %v1012_v12 = vld [vmem:[#allocation7 + $0x34] sm:$0xf]  ;;  %v959_v17 = vld [vmem:[#allocation7 + $0x104] sm:$0xf0] }
  0x2b   :  { %v866_v13 = vor.u32 %v1014_v11, %v865_v10  ;;  %v1036_v16 = vld [vmem:[#allocation7 + $0xf4] sm:$0xf]  ;;  %v845_v19 = vld [vmem:[#allocation7 + $0x8] sm:$0xf]  ;;  %v1009_v20 = vld [vmem:[#allocation7 + $0x18] sm:$0xf0] }
  0x2c   :  { %v962_v18 = vor.u32 %v1036_v16, %v959_v17  ;;  %v1007_v21 = vld [vmem:[#allocation7 + $0xc] sm:$0xf]  ;;  %v939_v26 = vld [vmem:[#allocation7 + $0xdc] sm:$0xf0]  ;;  %v993_v28 = vld [vmem:[#allocation7 + $0x128] sm:$0xf] }
  0x2d   :  { %198 = vmatpush.bf16.msra.mxu0 %v1000_v8  ;;  %1051 = vmatpush.bf16.msra.mxu3 %v1000_v8  ;;  %v979_v8 = vld [vmem:[#allocation7 + $0x12c] sm:$0xf0]  ;;  %v1045_v29 = vld [vmem:[#allocation7 + $0x138] sm:$0xf0]  ;;  %v919_v32 = vld [vmem:[#allocation7 + $0xb4] sm:$0xf0] }
  0x2e   :  { %1058 = vmatpush.bf16.msra.mxu2 %v898_v40  ;;  %480 = vmatpush.bf16.msra.mxu1 %v898_v40  ;;  %v982_v9 = vor.u32 %v1041_v7, %v979_v8  ;;  %v994_v30 = vor.u32 %v1045_v29, %v993_v28  ;;  %v1021_v37 = vld [vmem:[#allocation7 + $0x7c] sm:$0xf]  ;;  %v899_v38 = vld [vmem:[#allocation7 + $0x8c] sm:$0xf0]  ;;  %v953_v40 = vld [vmem:[#allocation7 + $0xd8] sm:$0xf] }
  0x2f   :  { %v902_v39 = vor.u32 %v1021_v37, %v899_v38  ;;  %v1035_v41 = vld [vmem:[#allocation7 + $0xe8] sm:$0xf0]  ;;  %v1016_v42 = vld [vmem:[#allocation7 + $0x54] sm:$0xf]  ;;  %v933_v46 = vld [vmem:[#allocation7 + $0xb0] sm:$0xf] }
  0x30   :  { %v1030_v47 = vld [vmem:[#allocation7 + $0xc0] sm:$0xf0]  ;;  %v859_v50 = vld [vmem:[#allocation7 + $0x3c] sm:$0xf0]  ;;  %v839_v56 = vld [vmem:[#allocation7 + $0x14] sm:$0xf0] }
  0x31   :  { %199 = vmatpush.bf16.msra.mxu0 %v999_v14  ;;  %1052 = vmatpush.bf16.msra.mxu3 %v999_v14  ;;  %v867_v14 = vld [vmem:[#allocation7 + $0x44] sm:$0xf0]  ;;  %v934_v48 = vor.u32 %v1030_v47, %v933_v46  ;;  %v1006_v55 = vld [vmem:[#allocation7 + $0x4] sm:$0xf]  ;;  %v893_v57 = vld [vmem:[#allocation7 + $0x60] sm:$0xf] }
  0x32   :  { %1059 = vmatpush.bf16.msra.mxu2 %v878_v49  ;;  %481 = vmatpush.bf16.msra.mxu1 %v878_v49  ;;  %v870_v15 = vor.u32 %v1012_v12, %v867_v14  ;;  %v1011_v49 = vld [vmem:[#allocation7 + $0x2c] sm:$0xf]  ;;  %v873_v62 = vld [vmem:[#allocation7 + $0x38] sm:$0xf]  ;;  %v1010_v2 = vld [vmem:[#allocation7 + $0x20] sm:$0xf0] }
  0x33   :  { %v862_v51 = vor.u32 %v1011_v49, %v859_v50  ;;  %v1015_v63 = vld [vmem:[#allocation7 + $0x48] sm:$0xf0] }
  0x34   :  { %v874_v0 = vor.u32 %v1015_v63, %v873_v62 }
  0x35   :  { %200 = vmatpush.bf16.msra.mxu0 %v998_v22  ;;  %1053 = vmatpush.bf16.msra.mxu3 %v998_v22  ;;  %v846_v22 = vor.u32 %v1009_v20, %v845_v19 }
  0x36   :  { %1060 = vmatpush.bf16.msra.mxu2 %v858_v58  ;;  %482 = vmatpush.bf16.msra.mxu1 %v858_v58  ;;  %v842_v58 = vor.u32 %v1006_v55, %v839_v56  ;;  %v734_v56 = vld [vmem:[#allocation10 + $0x40] sm:$0xff] }
  0x38   :  { %201 = vmatmul.bf16.vlgmr.msra.gmra.mxu0 %v995_v23  ;;  %211 = vmatmul.bf16.vlgmr.msra.gmra.mxu3 %v997_v31  ;;  %v847_v23 = vld [vmem:[#allocation7 + $0x1c] sm:$0xf0]  ;;  %v1026_v31 = vld [vmem:[#allocation7 + $0xa4] sm:$0xf] }
  0x39   :  { %522 = vmatpush.bf16.msrb.mxu3 %v986_v24  ;;  %546 = vmatpush.bf16.msrb.mxu0 %v990_v25  ;;  %v850_v24 = vor.u32 %v1007_v21, %v847_v23  ;;  %v1031_v25 = vld [vmem:[#allocation7 + $0xcc] sm:$0xf]  ;;  %v922_v33 = vor.u32 %v1026_v31, %v919_v32 }
  0x3a   :  { %1061 = vmatpush.bf16.msra.mxu2 %v838_v6  ;;  %483 = vmatpush.bf16.msra.mxu1 %v838_v6  ;;  %v942_v27 = vor.u32 %v1031_v25, %v939_v26  ;;  %v741_v23 = vld [vmem:[#allocation10 + $0x78] sm:$0xff]  ;;  %v739_v26 = vld [vmem:[#allocation10 + $0x68] sm:$0xff] }
  0x3d   :  { %523 = vmatpush.bf16.msrb.mxu3 %v966_v34  ;;  %547 = vmatpush.bf16.msrb.mxu0 %v970_v35  ;;  %v973_v34 = vld [vmem:[#allocation7 + $0x100] sm:$0xf]  ;;  %v1040_v35 = vld [vmem:[#allocation7 + $0x110] sm:$0xf0] }
  0x3e   :  { %498 = vmatpush.bf16.msrb.mxu2 %v982_v9  ;;  %570 = vmatpush.bf16.msrb.mxu1 %v994_v30  ;;  %v974_v36 = vor.u32 %v1040_v35, %v973_v34  ;;  %v737_v35 = vld [vmem:[#allocation10 + $0x58] sm:$0xff] }
  0x41   :  { %524 = vmatpush.bf16.msrb.mxu3 %v946_v43  ;;  %548 = vmatpush.bf16.msrb.mxu0 %v950_v44  ;;  %v954_v43 = vor.u32 %v1035_v41, %v953_v40  ;;  %v879_v44 = vld [vmem:[#allocation7 + $0x64] sm:$0xf0]  ;;  %v735_v41 = vld [vmem:[#allocation10 + $0x48] sm:$0xff] }
  0x42   :  { %499 = vmatpush.bf16.msrb.mxu2 %v962_v18  ;;  %571 = vmatpush.bf16.msrb.mxu1 %v974_v36  ;;  %v882_v45 = vor.u32 %v1016_v42, %v879_v44  ;;  %v736_v36 = vld [vmem:[#allocation10 + $0x50] sm:$0xff] }
  0x45   :  { %525 = vmatpush.bf16.msrb.mxu3 %v926_v52  ;;  %549 = vmatpush.bf16.msrb.mxu0 %v930_v53  ;;  %v913_v52 = vld [vmem:[#allocation7 + $0x88] sm:$0xf]  ;;  %v1025_v53 = vld [vmem:[#allocation7 + $0x98] sm:$0xf0] }
  0x46   :  { %500 = vmatpush.bf16.msrb.mxu2 %v942_v27  ;;  %572 = vmatpush.bf16.msrb.mxu1 %v954_v43  ;;  %v914_v54 = vor.u32 %v1025_v53, %v913_v52  ;;  %v738_v27 = vld [vmem:[#allocation10 + $0x60] sm:$0xff] }
  0x48   :  { %206 = vmatmul.bf16.gmra.mxu0 %v996_v61 }
  0x49   :  { %526 = vmatpush.bf16.msrb.mxu3 %v906_v59  ;;  %550 = vmatpush.bf16.msrb.mxu0 %v910_v60  ;;  %v1020_v59 = vld [vmem:[#allocation7 + $0x70] sm:$0xf0] }
  0x4a   :  { %501 = vmatpush.bf16.msrb.mxu2 %v922_v33  ;;  %573 = vmatpush.bf16.msrb.mxu1 %v934_v48  ;;  %v894_v60 = vor.u32 %v1020_v59, %v893_v57 }
  0x4d   :  { %527 = vmatpush.bf16.msrb.mxu3 %v886_v1  ;;  %551 = vmatpush.bf16.msrb.mxu0 %v890_v5  ;;  %v853_v1 = vld [vmem:[#allocation7 + $0x10] sm:$0xf] }
  0x4e   :  { %502 = vmatpush.bf16.msrb.mxu2 %v902_v39  ;;  %574 = vmatpush.bf16.msrb.mxu1 %v914_v54  ;;  %v854_v3 = vor.u32 %v1010_v2, %v853_v1 }
  0x51   :  { %528 = vmatpush.bf16.msrb.mxu3 %v866_v13  ;;  %552 = vmatpush.bf16.msrb.mxu0 %v870_v15 }
  0x52   :  { %503 = vmatpush.bf16.msrb.mxu2 %v882_v45  ;;  %575 = vmatpush.bf16.msrb.mxu1 %v894_v60 }
  0x55   :  { %529 = vmatpush.bf16.msrb.mxu3 %v846_v22  ;;  %553 = vmatpush.bf16.msrb.mxu0 %v850_v24  ;;  %v740_v24 = vld [vmem:[#allocation10 + $0x70] sm:$0xff] }
  0x56   :  { %504 = vmatpush.bf16.msrb.mxu2 %v862_v51  ;;  %576 = vmatpush.bf16.msrb.mxu1 %v874_v0 }
  0x5a   :  { %505 = vmatpush.bf16.msrb.mxu2 %v842_v58  ;;  %577 = vmatpush.bf16.msrb.mxu1 %v854_v3  ;;  %v732_v3 = vld [vmem:[#allocation10 + $0x30] sm:$0xff] }
  0xb5   :  { %v202_v61 = vpop.f32.mrf.mxu0 }
  0xbb   :  { %v212_v4 = vpop.f32.mrf.mxu3 }
  0xbd   :  { %v204_v5 = vpop.f32.mrf.mxu0 }
  0xbe   :  { %v217_v6 = vpack.c.bf16 %v204_v5, %v202_v61  ;;  %v733_v61 = vld [vmem:[#allocation10 + $0x38] sm:$0xff] }
  0xc0   :  { %484 = vmatmul.bf16.vlgmr.msra.gmra.mxu1 %v217_v6  ;;  %530 = vmatmul.bf16.vlgmr.msrb.gmra.mxu3 %v217_v6 }
  0xc1   :  { %554 = vmatmul.bf16.vlgmr.msrb.gmra.mxu0 %v217_v6 }
  0xc3   :  { %v214_v7 = vpop.f32.mrf.mxu3 }
  0xc4   :  { %v219_v8 = vpack.c.bf16 %v214_v7, %v212_v4  ;;  %v731_v4 = vld [vmem:[#allocation10 + $0x28] sm:$0xff] }
  0xc5   :  { %v207_v9 = vpop.f32.mrf.mxu0 }
  0xc6   :  { %493 = vmatmul.bf16.vlgmr.msra.gmra.mxu2 %v219_v8 }
  0xc7   :  { %751 = vmatpush.msra.mxu2 %v741_v23 }
  0xc9   :  { %752 = vmatpush.msra.mxu2 %v740_v24 }
  0xcb   :  { %753 = vmatpush.msra.mxu2 %v739_v26 }
  0xcd   :  { %v209_v10 = vpop.f32.mrf.mxu0  ;;  %754 = vmatpush.msra.mxu2 %v738_v27 }
  0xce   :  { %v218_v11 = vpack.c.bf16 %v209_v10, %v207_v9  ;;  %v730_v9 = vld [vmem:[#allocation10 + $0x20] sm:$0xff] }
  0xcf   :  { %755 = vmatpush.msra.mxu2 %v737_v35 }
  0xd0   :  { %489 = vmatmul.bf16.gmra.mxu1 %v218_v11  ;;  %535 = vmatmul.bf16.gmra.mxu3 %v218_v11 }
  0xd1   :  { %559 = vmatmul.bf16.gmra.mxu0 %v218_v11  ;;  %756 = vmatpush.msra.mxu2 %v736_v36  ;;  %v707_v36 = vld [vmem:[#allocation8 + $0x8] sm:$0xff] }
  0xd3   :  { %757 = vmatpush.msra.mxu2 %v735_v41  ;;  %v706_v41 = vld [vmem:[#allocation8] sm:$0xff] }
  0xd5   :  { %758 = vmatpush.msra.mxu2 %v734_v56 }
  0xd6   :  { %506 = vmatmul.bf16.vlgmr.msrb.gmra.mxu2 %v217_v6 }
  0xd7   :  { %759 = vmatpush.msra.mxu2 %v733_v61 }
  0xd9   :  { %760 = vmatpush.msra.mxu2 %v732_v3 }
  0xdb   :  { %761 = vmatpush.msra.mxu2 %v731_v4 }
  0xdd   :  { %762 = vmatpush.msra.mxu2 %v730_v9 }
  0xe0   :  { %540 = vmatmul.bf16.gmra.mxu3 %v219_v8  ;;  %578 = vmatmul.bf16.vlgmr.msrb.gmra.mxu1 %v217_v6 }
  0xe1   :  { %564 = vmatmul.bf16.gmra.mxu0 %v219_v8 }
  0xe6   :  { %511 = vmatmul.bf16.gmra.mxu2 %v218_v11 }
  0xf0   :  { %583 = vmatmul.bf16.gmra.mxu1 %v218_v11 }
  0xf6   :  { %516 = vmatmul.bf16.gmra.mxu2 %v219_v8 }
 0x100   :  { %588 = vmatmul.bf16.gmra.mxu1 %v219_v8 }
 0x13d   :  { %v485_v12 = vpop.f32.mrf.mxu1 }
 0x13e   :  { %v555_v17 = vpop.f32.mrf.mxu0 }
 0x13f   :  { %v651_v57 = vrot.slane %v555_v17, 3 }
 0x143   :  { %v531_v15 = vpop.f32.mrf.mxu3 }
 0x144   :  { %v626_v48 = vrot.slane %v531_v15, 2  ;;  %v729_v15 = vld [vmem:[#allocation10 + $0x18] sm:$0xff] }
 0x145   :  { %v487_v13 = vpop.f32.mrf.mxu1  ;;  %763 = vmatpush.msra.mxu2 %v729_v15 }
 0x146   :  { %v557_v21 = vpop.f32.mrf.mxu0 }
 0x147   :  { %v652_v52 = vrot.slane %v557_v21, 3  ;;  %v728_v21 = vld [vmem:[#allocation10 + $0x10] sm:$0xff] }
 0x148   :  { %764 = vmatpush.msra.mxu2 %v728_v21 }
 0x149   :  { %v1295_v14 = vpop.f32.mrf.mxu2  ;;  %v653_v62 = vsel %vm650_vm2, %v651_v57, %v652_v52 }
 0x14b   :  { %v533_v20 = vpop.f32.mrf.mxu3 }
 0x14c   :  { %v627_v42 = vrot.slane %v533_v20, 2 }
 0x14d   :  { %v490_v16 = vpop.f32.mrf.mxu1 }
 0x14e   :  { %v560_v30 = vpop.f32.mrf.mxu0  ;;  %v628_v53 = vsel %vm625_vm1, %v626_v48, %v627_v42 }
 0x14f   :  { %v654_v49 = vrot.slane %v560_v30, 3 }
 0x151   :  { %v496_v18 = vpop.f32.mrf.mxu2  ;;  %v655_v58 = vsel %vm650_vm2, %v652_v52, %v654_v49 }
 0x153   :  { %v536_v28 = vpop.f32.mrf.mxu3 }
 0x154   :  { %v629_v37 = vrot.slane %v536_v28, 2  ;;  %v727_v28 = vld [vmem:[#allocation10 + $0x8] sm:$0xff] }
 0x155   :  { %v1297_v19 = vpop.f32.mrf.mxu1  ;;  %765 = vmatpush.msra.mxu2 %v727_v28 }
 0x156   :  { %v1305_v44 = vpop.f32.mrf.mxu0  ;;  %v630_v50 = vsel %vm625_vm1, %v627_v42, %v629_v37 }
 0x159   :  { %v507_v22 = vpop.f32.mrf.mxu2 }
 0x15a   :  { %v601_v33 = vrot.slane %v507_v22, 1 }
 0x15b   :  { %v1302_v40 = vpop.f32.mrf.mxu3 }
 0x15c   :  { %v631_v22 = vrot.slane %v1302_v40, 2 }
 0x15d   :  { %v1299_v25 = vpop.f32.mrf.mxu1 }
 0x15e   :  { %v676_v5 = vrot.slane %v1299_v25, 4  ;;  %v565_v7 = vpop.f32.mrf.mxu0 }
 0x15f   :  { %v657_v23 = vrot.slane %v565_v7, 3 }
 0x161   :  { %v509_v29 = vpop.f32.mrf.mxu2 }
 0x162   :  { %v602_v32 = vrot.slane %v509_v29, 1  ;;  %v656_v29 = vrot.slane %v1305_v44, 3 }
 0x163   :  { %v541_v0 = vpop.f32.mrf.mxu3 }
 0x164   :  { %v603_v38 = vsel %vm600_vm0, %v601_v33, %v602_v32  ;;  %v632_v16 = vrot.slane %v541_v0, 2  ;;  %v658_v35 = vsel %vm650_vm2, %v656_v29, %v657_v23 }
 0x165   :  { %v581_v31 = vpop.f32.mrf.mxu1  ;;  %v615_v45 = vadd.f32 %v603_v38, %v485_v12  ;;  %v1074_v12 = vld [vmem:[%s1338_s3] ss:$0 sm:$0xff] }
 0x166   :  { %v677_v63 = vrot.slane %v581_v31, 4  ;;  %v633_v30 = vsel %vm625_vm1, %v631_v22, %v632_v16  ;;  %v567_v38 = vpop.f32.mrf.mxu0 }
 0x167   :  { %v640_v54 = vadd.f32 %v628_v53, %v615_v45 }
 0x168   :  { %v678_v10 = vsel %vm675_vm3, %v676_v5, %v677_v63 }
 0x169   :  { %v512_v34 = vpop.f32.mrf.mxu2  ;;  %v665_v1 = vadd.f32 %v653_v62, %v640_v54 }
 0x16a   :  { %v604_v39 = vrot.slane %v512_v34, 1  ;;  %v726_v34 = vld [vmem:[#allocation10] sm:$0xff] }
 0x16b   :  { %v690_v11 = vadd.f32 %v678_v10, %v665_v1  ;;  %v543_v31 = vpop.f32.mrf.mxu3  ;;  %766 = vmatpush.msra.mxu2 %v726_v34 }
 0x16c   :  { %v605_v43 = vsel %vm600_vm0, %v602_v32, %v604_v39  ;;  %v634_v42 = vrot.slane %v543_v31, 2 }
 0x16d   :  { %v616_v46 = vadd.f32 %v605_v43, %v487_v13  ;;  %v584_v47 = vpop.f32.mrf.mxu1  ;;  %v698_v25 = vadd.f32 %v1074_v12, %v690_v11 }
 0x16e   :  { %v679_v59 = vrot.slane %v584_v47, 4  ;;  %v635_v53 = vsel %vm625_vm1, %v632_v16, %v634_v42 }
 0x16f   :  { %v641_v51 = vadd.f32 %v630_v50, %v616_v46  ;;  %v702_v39 = vmax.f32 %v698_v25, 0.0  ;;  %v659_v46 = vrot.slane %v567_v38, 3 }
 0x170   :  { %v680_v6 = vsel %vm675_vm3, %v677_v63, %v679_v59 }
 0x171   :  { %v514_v55 = vpop.f32.mrf.mxu2  ;;  %v666_v60 = vadd.f32 %v655_v58, %v641_v51  ;;  %v708_v49 = vmul.f32 %v706_v41, %v702_v39  ;;  %v660_v57 = vsel %vm650_vm2, %v657_v23, %v659_v46 }
 0x172   :  { %v606_v17 = vrot.slane %v514_v55, 1 }
 0x173   :  { %v691_v8 = vadd.f32 %v680_v6, %v666_v60 }
 0x175   :  { %v586_v2 = vpop.f32.mrf.mxu1  ;;  %v699_v20 = vadd.f32 %v1074_v12, %v691_v8 }
 0x176   :  { %v681_v43 = vrot.slane %v586_v2, 4 }
 0x177   :  { %v703_v32 = vmax.f32 %v699_v20, 0.0 }
 0x179   :  { %v517_v13 = vpop.f32.mrf.mxu2  ;;  %v709_v45 = vmul.f32 %v707_v36, %v703_v32 }
 0x17a   :  { %v607_v18 = vrot.slane %v517_v13, 1 }
 0x17b   :  { %v712_v55 = vmax.f32 %v708_v49, %v709_v45 }
 0x17c   :  { %v608_v24 = vsel %vm600_vm0, %v606_v17, %v607_v18 }
 0x17d   :  { %v617_v26 = vadd.f32 %v608_v24, %v1297_v19  ;;  %v589_v27 = vpop.f32.mrf.mxu1  ;;  %v713_v62 = vrot.slane %v712_v55, 4 }
 0x17e   :  { %v682_v37 = vrot.slane %v589_v27, 4 }
 0x17f   :  { %v642_v33 = vadd.f32 %v633_v30, %v617_v26  ;;  %v714_v2 = vmax.f32 %v712_v55, %v713_v62 }
 0x180   :  { %v683_v47 = vsel %vm675_vm3, %v681_v43, %v682_v37 }
 0x181   :  { %v667_v40 = vadd.f32 %v658_v35, %v642_v33  ;;  %v519_v19 = vpop.f32.mrf.mxu2  ;;  %v715_v5 = vrot.slane %v714_v2, 2 }
 0x182   :  { %v609_v44 = vrot.slane %v519_v19, 1 }
 0x183   :  { %v692_v50 = vadd.f32 %v683_v47, %v667_v40  ;;  %v716_v7 = vmax.f32 %v714_v2, %v715_v5 }
 0x184   :  { %v610_v48 = vsel %vm600_vm0, %v607_v18, %v609_v44 }
 0x185   :  { %v618_v51 = vadd.f32 %v610_v48, %v1295_v14  ;;  %v591_v52 = vpop.f32.mrf.mxu1  ;;  %v700_v58 = vadd.f32 %v1074_v12, %v692_v50  ;;  %v717_v10 = vrot.slane %v716_v7, 1 }
 0x186   :  { %v684_v54 = vrot.slane %v591_v52, 4 }
 0x187   :  { %v643_v56 = vadd.f32 %v635_v53, %v618_v51  ;;  %v704_v63 = vmax.f32 %v700_v58, 0.0  ;;  %v718_v15 = vmax.f32 %v716_v7, %v717_v10 }
 0x188   :  { %v685_v60 = vsel %vm675_vm3, %v682_v37, %v684_v54 }
 0x189   :  { %v668_v59 = vadd.f32 %v660_v57, %v643_v56  ;;  %v710_v3 = vmul.f32 %v706_v41, %v704_v63 }
 0x18b   :  { %v693_v61 = vadd.f32 %v685_v60, %v668_v59 }
 0x18d   :  { %v701_v0 = vadd.f32 %v1074_v12, %v693_v61  ;;  %v1075_v12 = vld [vmem:[%s1341_s6] ss:$0 sm:$0xff] }
 0x18f   :  { %v705_v1 = vmax.f32 %v701_v0, 0.0 }
 0x191   :  { %v711_v14 = vmul.f32 %v707_v36, %v705_v1 }
 0x193   :  { %v719_v4 = vmax.f32 %v710_v3, %v711_v14 }
 0x195   :  { %v720_v6 = vrot.slane %v719_v4, 4 }
 0x197   :  { %v721_v8 = vmax.f32 %v719_v4, %v720_v6 }
 0x199   :  { %v722_v9 = vrot.slane %v721_v8, 2 }
 0x19b   :  { %v723_v11 = vmax.f32 %v721_v8, %v722_v9 }
 0x19d   :  { %v724_v13 = vrot.slane %v723_v11, 1 }
 0x19f   :  { %v725_v16 = vmax.f32 %v723_v11, %v724_v13 }
 0x1a1   :  { %v749_v17 = vsel %vm748_vm4, %v725_v16, %v718_v15 }
 0x1a2   :  { %767 = vmatmul.f32.vlgmr.msra.gmra.mxu2 %v749_v17 }
 0x225   :  { %v768_v18 = vpop.f32.mrf.mxu2 }
 0x226   :  { %v769_v20 = vadd.f32 %v1075_v12, %v768_v18 }
 0x228   :  { %771 = vst [vmem:[#allocation11] sm:$0x3] %v769_v20 }
 0x229   :  { %782 = dma.vmem_to_hbm [thread:$0]  %s778_s8, 32, %s780_s11, [#allocation4]  }
 0x22a   :  { %1226 = dma.done.wait [#allocation4], 32  }
 0x22b   :  { %1227 = vsyncadd [#allocation4], 4294967264 }
 0x22c   :  { %787 = vsyncpa [#allocation3], 1 }
 0x22d   :  { %788 = vsyncpa [#allocation6], 1 }
 0x22e   :  { %789 = vsyncpa [#allocation9], 1 }
 0x22f   :  { %790 = vsyncpa [#allocation4], 1 }

</bundles_post_ra>
